<compile_context>
chip_gen: v6e
topology: v6e:2x2x1
jax: 0.10.0
libtpu: 0.0.40
codegen_flags: <defaults>
</compile_context>

<pallas_src>
import functools

import jax
import jax.numpy as jnp
import numpy as np
from jax.experimental import pallas as pl
from jax.experimental.pallas import tpu as pltpu


# ----------------------------------------------------------------------------
# Deterministic parameter construction.
# TODO(synk): compute_P source not provided; deterministic orthographic
# stand-in built from the detector geometry.
# ----------------------------------------------------------------------------
def compute_P(proj_geom):
    W = proj_geom["DetectorColCount"]
    H = proj_geom["DetectorRowCount"]
    sx = proj_geom["DetectorSpacingX"]
    sy = proj_geom["DetectorSpacingY"]
    max_sino = W * sx * 2.0
    return np.array(
        [
            [2.0 / (W * sx), 0.0, 0.0, 0.0],
            [0.0, 2.0 / (H * sy), 0.0, 0.0],
            [0.0, 0.0, -1.0 / max_sino, -1.0],
            [0.0, 0.0, 0.0, 1.0],
        ],
        dtype=np.float32,
    )


def _round_up(n, m):
    return ((n + m - 1) // m) * m


def _affine_row(row, X, Y, Z):
    """p0*X + p1*Y + p2*Z + p3 with trace-time folding of zero coefficients."""
    p0, p1, p2, p3 = row
    acc = None
    for c, v in ((p0, X), (p1, Y), (p2, Z)):
        if c != 0.0:
            t = v * c
            acc = t if acc is None else acc + t
    if acc is None:
        return jnp.full_like(X, p3)
    return acc + p3 if p3 != 0.0 else acc


# ----------------------------------------------------------------------------
# Fused kernel: for a (TB angles) x (TF faces) tile, recompute the vertex
# transform for all 3 corners and emit proj / len / front_facing directly.
#   cs_ref:      [TB, 2]   (cos, sin) per angle
#   corners_ref: [9, TF]   rows = x0,y0,z0,x1,y1,z1,x2,y2,z2  (raw coords)
#   proj_ref:    [6, TB, TF]  rows = sx0,sy0,sx1,sy1,sx2,sy2  (screen coords)
#   len_ref:     [3, TB, TF]
#   ff_ref:      [TB, TF]
# ----------------------------------------------------------------------------
def fused_fp_kernel(cs_ref, corners_ref, proj_ref, len_ref, ff_ref, *,
                    P, max_sino, height, width, parallel):
    ct = cs_ref[:, 0:1]  # [TB, 1]
    st = cs_ref[:, 1:2]  # [TB, 1]

    row3 = P[3]
    row3_const = (row3[0] == 0.0 and row3[1] == 0.0 and row3[2] == 0.0)
    if row3_const:
        # Perspective divide is a constant -> fold into viewport transform.
        inv_w = 1.0 / (row3[3] + 1e-8)
        sx_scale = inv_w * 0.5 * width
        sx_off = 0.5 * width
        sy_scale = inv_w * 0.5 * height
        sy_off = 0.5 * height - 0.5

    Xs, Ys, Zs = [], [], []
    for c in range(3):
        x = corners_ref[3 * c + 0:3 * c + 1, :]  # [1, TF]
        y = corners_ref[3 * c + 1:3 * c + 2, :]
        z = corners_ref[3 * c + 2:3 * c + 3, :]

        # rotate about z, M_left = [[1,0,0],[0,0,-1],[0,1,0]], then +V_t
        X = ct * x + st * y                 # [TB, TF]
        Z = (ct * y - st * x) - max_sino    # [TB, TF]
        Y = jnp.broadcast_to(-z, X.shape)   # [TB, TF]

        len_ref[c] = jnp.sqrt(X * X + Y * Y + Z * Z)

        # P @ [X; Y; Z; 1]  (P entries are compile-time Python constants)
        r0 = _affine_row(P[0], X, Y, Z)
        r1 = _affine_row(P[1], X, Y, Z)
        if row3_const:
            sx_ = r0 * sx_scale + sx_off
            sy_ = sy_off - r1 * sy_scale
        else:
            r3 = _affine_row(P[3], X, Y, Z)
            inv = 1.0 / (r3 + 1e-8)         # exact divide (rasterizer-safe)
            sx_ = (r0 * inv + 1.0) * (0.5 * width)
            sy_ = (0.5 * height) * (1.0 - r1 * inv) - 0.5
        proj_ref[2 * c] = sx_
        proj_ref[2 * c + 1] = sy_

        Xs.append(X); Ys.append(Y); Zs.append(Z)

    # front-facing test from the transformed corners
    dx1 = Xs[1] - Xs[0]; dy1 = Ys[1] - Ys[0]
    dx2 = Xs[2] - Xs[0]; dy2 = Ys[2] - Ys[0]
    if parallel:
        # -normal_z
        ff_ref[...] = dy1 * dx2 - dx1 * dy2
    else:
        dz1 = Zs[1] - Zs[0]; dz2 = Zs[2] - Zs[0]
        nx = dy1 * dz2 - dz1 * dy2
        ny = dz1 * dx2 - dx1 * dz2
        nz = dx1 * dy2 - dy1 * dx2
        ff_ref[...] = Xs[0] * nx + Ys[0] * ny + Zs[0] * nz


# ----------------------------------------------------------------------------
# Wrapper ("FP.forward" minus the CUDA rasterizer)
# ----------------------------------------------------------------------------
def fp_forward(verts_vx3, faces_fx3, idx_angles, angles, P, proj_geom,
               tile_f=2048, tile_b=8):
    V = verts_vx3.shape[0]
    F = faces_fx3.shape[0]
    B = idx_angles.shape[0]
    H = float(proj_geom["DetectorRowCount"])
    W = float(proj_geom["DetectorColCount"])
    max_sino = float(proj_geom["DetectorColCount"]
                     * proj_geom["DetectorSpacingX"] * 2)
    parallel = proj_geom["type"] == "parallel3d"

    tile_f = _round_up(int(tile_f), 128)
    tile_b = _round_up(int(tile_b), 8)
    TF = min(tile_f, _round_up(max(F, 1), 128))
    TB = min(tile_b, _round_up(max(B, 1), 8))
    Fp = _round_up(max(F, 1), TF)
    Bp = _round_up(max(B, 1), TB)

    P_np = np.asarray(P, np.float32)
    P_tup = tuple(tuple(float(v) for v in P_np[i]) for i in range(4))

    th = angles[idx_angles].astype(jnp.float32)
    cs = jnp.stack([jnp.cos(th), jnp.sin(th)], axis=1)        # [B, 2]
    cs = jnp.pad(cs, ((0, Bp - B), (0, 0)))                   # [Bp, 2]

    # Single, angle-independent major-axis gather of raw face-corner coords,
    # packed lane-dense in F (rows = x0,y0,z0,x1,y1,z1,x2,y2,z2).
    vf = jnp.take(verts_vx3.astype(jnp.float32),
                  faces_fx3.reshape(-1), axis=0)              # [3F, 3]
    corners = vf.reshape(F, 3, 3).transpose(1, 2, 0).reshape(9, F)
    corners = jnp.pad(corners, ((0, 0), (0, Fp - F)))         # [9, Fp]

    # VMEM budget: double-buffered blocks + ~24 live [TB,TF] f32 temporaries.
    out_bytes = 4 * (6 + 3 + 1) * TB * TF
    in_bytes = 4 * (TB * 2 + 9 * TF)
    temp_bytes = 4 * 24 * TB * TF
    vmem_limit = int(min(64 * 1024 * 1024,
                         max(2 * (in_bytes + out_bytes) + temp_bytes + (2 << 20),
                             16 * 1024 * 1024)))

    proj_raw, len_raw, ff_raw = pl.pallas_call(
        functools.partial(fused_fp_kernel, P=P_tup, max_sino=max_sino,
                          height=H, width=W, parallel=parallel),
        out_shape=(
            jax.ShapeDtypeStruct((6, Bp, Fp), jnp.float32),
            jax.ShapeDtypeStruct((3, Bp, Fp), jnp.float32),
            jax.ShapeDtypeStruct((Bp, Fp), jnp.float32),
        ),
        grid=(Bp // TB, Fp // TF),
        in_specs=[
            pl.BlockSpec((TB, 2), lambda b, f: (b, 0)),   # cos/sin per angle tile
            pl.BlockSpec((9, TF), lambda b, f: (0, f)),   # raw corner coords
        ],
        out_specs=(
            pl.BlockSpec((6, TB, TF), lambda b, f: (0, b, f)),
            pl.BlockSpec((3, TB, TF), lambda b, f: (0, b, f)),
            pl.BlockSpec((TB, TF), lambda b, f: (b, f)),
        ),
        compiler_params=pltpu.CompilerParams(
            dimension_semantics=("parallel", "parallel"),
            vmem_limit_bytes=vmem_limit),
    )(cs, corners)

    # One transpose each from the lane-dense kernel layout to the module's
    # [B, F, k] layouts.
    proj_bxfx6 = jnp.moveaxis(proj_raw[:, :B, :F], 0, 2)      # [B, F, 6]
    len_bxfx3 = jnp.moveaxis(len_raw[:, :B, :F], 0, 2)        # [B, F, 3]
    front_facing_bxfx1 = ff_raw[:B, :F, None]                 # [B, F, 1]

    # TODO(synk): phat = Rasterizer()(proj_bxfx6, len_bxfx3, front_facing,
    # labels_fx2, mus_n, H, W, max_sino, backprop) and get_valid_mask(phat, ...)
    # are a custom CUDA op with no source available; not translated.
    return proj_bxfx6, len_bxfx3, front_facing_bxfx1


# ----------------------------------------------------------------------------
# Pure-JAX reference for correctness checking
# ----------------------------------------------------------------------------
def fp_forward_ref(verts_vx3, faces_fx3, idx_angles, angles, P, proj_geom):
    H = float(proj_geom["DetectorRowCount"])
    W = float(proj_geom["DetectorColCount"])
    max_sino = float(proj_geom["DetectorColCount"]
                     * proj_geom["DetectorSpacingX"] * 2)
    th = angles[idx_angles]
    ct = jnp.cos(th)[:, None]
    st = jnp.sin(th)[:, None]
    x = verts_vx3[:, 0][None, :]
    y = verts_vx3[:, 1][None, :]
    z = verts_vx3[:, 2][None, :]
    X = x * ct + y * st
    Y = -z * jnp.ones_like(X)
    Z = (-x * st + y * ct) - max_sino
    lenv = jnp.sqrt(X * X + Y * Y + Z * Z)
    P = jnp.asarray(P, jnp.float32)
    r0 = P[0, 0] * X + P[0, 1] * Y + P[0, 2] * Z + P[0, 3]
    r1 = P[1, 0] * X + P[1, 1] * Y + P[1, 2] * Z + P[1, 3]
    r3 = P[3, 0] * X + P[3, 1] * Y + P[3, 2] * Z + P[3, 3]
    inv = 1.0 / (r3 + 1e-8)
    sx = (r0 * inv + 1.0) * 0.5 * W
    sy = H * (1.0 - r1 * inv) * 0.5 - 0.5
    f0, f1, f2 = faces_fx3[:, 0], faces_fx3[:, 1], faces_fx3[:, 2]
    vm = jnp.stack([X, Y, Z], axis=2)  # [B, V, 3]
    bvf0, bvf1, bvf2 = vm[:, f0], vm[:, f1], vm[:, f2]
    normal = jnp.cross(bvf1 - bvf0, bvf2 - bvf0, axis=2)
    if proj_geom["type"] == "parallel3d":
        ff = -normal[:, :, 2:3]
    else:
        ff = jnp.sum(bvf0 * normal, axis=2, keepdims=True)
    proj = jnp.stack([sx[:, f0], sy[:, f0], sx[:, f1], sy[:, f1],
                      sx[:, f2], sy[:, f2]], axis=2)
    lens = jnp.stack([lenv[:, f0], lenv[:, f1], lenv[:, f2]], axis=2)
    return proj, lens, ff


if __name__ == "__main__":
    proj_geom = {
        "type": "parallel3d",
        "DetectorRowCount": 16,
        "DetectorColCount": 16,
        "DetectorSpacingX": 1.0,
        "DetectorSpacingY": 1.0,
        "ProjectionAngles": np.linspace(0.0, np.pi, 8, endpoint=False),
    }
    P = compute_P(proj_geom)
    angles = jnp.asarray(proj_geom["ProjectionAngles"], jnp.float32)

    key = jax.random.PRNGKey(0)
    k1, k2 = jax.random.split(key)
    V, F, B = 12, 8, 2
    verts_vx3 = jax.random.normal(k1, (V, 3), dtype=jnp.float32) * 4.0
    faces_fx3 = jax.random.randint(k2, (F, 3), 0, V, dtype=jnp.int32)
    idx_angles = jnp.array([0, 3], dtype=jnp.int32)

    # Also exercise the general (non-constant P row 3) divide path.
    P_general = np.array(P, np.float32)
    P_general[3] = np.array([1e-3, -2e-3, 5e-4, 1.0], np.float32)

    cases = [
        (proj_geom, P),
        (dict(proj_geom, type="cone3d"), P),
        (dict(proj_geom, type="cone3d"), P_general),
    ]
    for geom, Pm in cases:
        out = fp_forward(verts_vx3, faces_fx3, idx_angles, angles, Pm, geom)
        jax.block_until_ready(out)
        ref = fp_forward_ref(verts_vx3, faces_fx3, idx_angles, angles, Pm, geom)
        for got, want in zip(out, ref):
            np.testing.assert_allclose(
                np.asarray(got), np.asarray(want), rtol=1e-3, atol=1e-2)

    print("KERNEL_OK")
</pallas_src>

<mosaic_0001>
module attributes {stable_mosaic.version = 11 : i64} {
  func.func @fused_fp_kernel(%arg0: i32, %arg1: i32, %arg2: memref<8x2xf32, #tpu.memory_space<vmem>>, %arg3: memref<9x128xf32, #tpu.memory_space<vmem>>, %arg4: memref<6x8x128xf32, #tpu.memory_space<vmem>>, %arg5: memref<3x8x128xf32, #tpu.memory_space<vmem>>, %arg6: memref<8x128xf32, #tpu.memory_space<vmem>>) attributes {dimension_semantics = [#tpu.dimension_semantics<parallel>, #tpu.dimension_semantics<parallel>], iteration_bounds = array<i64: 1, 1>, scalar_prefetch = 0 : i64, scratch_operands = 0 : i64, tpu.core_type = #tpu.core_type<tc>, window_params = [{transform_indices = @transform_0, window_bounds = array<i64: 8, 2>}, {transform_indices = @transform_1, window_bounds = array<i64: 9, 128>}, {transform_indices = @transform_2, window_bounds = array<i64: 6, 8, 128>}, {transform_indices = @transform_3, window_bounds = array<i64: 3, 8, 128>}, {transform_indices = @transform_4, window_bounds = array<i64: 8, 128>}]} {
    %c0 = arith.constant 0 : index
    %c0_0 = arith.constant 0 : index
    %0 = vector.load %arg2[%c0, %c0_0] : memref<8x2xf32, #tpu.memory_space<vmem>>, vector<8x1xf32>
    %c0_1 = arith.constant 0 : index
    %c1 = arith.constant 1 : index
    %1 = vector.load %arg2[%c0_1, %c1] : memref<8x2xf32, #tpu.memory_space<vmem>>, vector<8x1xf32>
    %c0_2 = arith.constant 0 : index
    %c0_3 = arith.constant 0 : index
    %2 = vector.load %arg3[%c0_2, %c0_3] : memref<9x128xf32, #tpu.memory_space<vmem>>, vector<1x128xf32>
    %c1_4 = arith.constant 1 : index
    %c0_5 = arith.constant 0 : index
    %3 = vector.load %arg3[%c1_4, %c0_5] : memref<9x128xf32, #tpu.memory_space<vmem>>, vector<1x128xf32>
    %c2 = arith.constant 2 : index
    %c0_6 = arith.constant 0 : index
    %4 = vector.load %arg3[%c2, %c0_6] : memref<9x128xf32, #tpu.memory_space<vmem>>, vector<1x128xf32>
    %5 = vector.broadcast %0 : vector<8x1xf32> to vector<8x128xf32>
    %6 = vector.broadcast %2 : vector<1x128xf32> to vector<8x128xf32>
    %7 = arith.mulf %5, %6 : vector<8x128xf32>
    %8 = vector.broadcast %1 : vector<8x1xf32> to vector<8x128xf32>
    %9 = vector.broadcast %3 : vector<1x128xf32> to vector<8x128xf32>
    %10 = arith.mulf %8, %9 : vector<8x128xf32>
    %11 = arith.addf %7, %10 : vector<8x128xf32>
    %12 = vector.broadcast %0 : vector<8x1xf32> to vector<8x128xf32>
    %13 = vector.broadcast %3 : vector<1x128xf32> to vector<8x128xf32>
    %14 = arith.mulf %12, %13 : vector<8x128xf32>
    %15 = vector.broadcast %1 : vector<8x1xf32> to vector<8x128xf32>
    %16 = vector.broadcast %2 : vector<1x128xf32> to vector<8x128xf32>
    %17 = arith.mulf %15, %16 : vector<8x128xf32>
    %18 = arith.subf %14, %17 : vector<8x128xf32>
    %cst = arith.constant 3.200000e+01 : f32
    %19 = vector.broadcast %cst : f32 to vector<8x128xf32>
    %20 = arith.subf %18, %19 : vector<8x128xf32>
    %cst_7 = arith.constant 0.000000e+00 : f32
    %21 = vector.broadcast %cst_7 : f32 to vector<1x128xf32>
    %22 = arith.subf %21, %4 : vector<1x128xf32>
    %23 = vector.shape_cast %22 : vector<1x128xf32> to vector<1x128xf32>
    %24 = vector.broadcast %23 : vector<1x128xf32> to vector<8x128xf32>
    %25 = arith.mulf %11, %11 : vector<8x128xf32>
    %26 = arith.mulf %24, %24 : vector<8x128xf32>
    %27 = arith.addf %25, %26 : vector<8x128xf32>
    %28 = arith.mulf %20, %20 : vector<8x128xf32>
    %29 = arith.addf %27, %28 : vector<8x128xf32>
    %30 = math.sqrt %29 : vector<8x128xf32>
    %c0_8 = arith.constant 0 : index
    %c0_9 = arith.constant 0 : index
    %c0_10 = arith.constant 0 : index
    %31 = vector.load %arg5[%c0_8, %c0_9, %c0_10] : memref<3x8x128xf32, #tpu.memory_space<vmem>>, vector<1x8x128xf32>
    %32 = vector.shape_cast %31 : vector<1x8x128xf32> to vector<8x128xf32>
    %33 = vector.shape_cast %30 : vector<8x128xf32> to vector<1x8x128xf32>
    tpu.vector_store %arg5[%c0_8, %c0_9, %c0_10], %33 {strides = array<i32>} : memref<3x8x128xf32, #tpu.memory_space<vmem>>, vector<1x8x128xf32>,
    %cst_11 = arith.constant 1.250000e-01 : f32
    %34 = vector.broadcast %cst_11 : f32 to vector<8x128xf32>
    %35 = arith.mulf %11, %34 : vector<8x128xf32>
    %cst_12 = arith.constant 1.250000e-01 : f32
    %36 = vector.broadcast %cst_12 : f32 to vector<8x128xf32>
    %37 = arith.mulf %24, %36 : vector<8x128xf32>
    %cst_13 = arith.constant 8.000000e+00 : f32
    %38 = vector.broadcast %cst_13 : f32 to vector<8x128xf32>
    %39 = arith.mulf %35, %38 : vector<8x128xf32>
    %cst_14 = arith.constant 8.000000e+00 : f32
    %40 = vector.broadcast %cst_14 : f32 to vector<8x128xf32>
    %41 = arith.addf %39, %40 : vector<8x128xf32>
    %cst_15 = arith.constant 8.000000e+00 : f32
    %42 = vector.broadcast %cst_15 : f32 to vector<8x128xf32>
    %43 = arith.mulf %37, %42 : vector<8x128xf32>
    %cst_16 = arith.constant 7.500000e+00 : f32
    %44 = vector.broadcast %cst_16 : f32 to vector<8x128xf32>
    %45 = arith.subf %44, %43 : vector<8x128xf32>
    %c0_17 = arith.constant 0 : index
    %c0_18 = arith.constant 0 : index
    %c0_19 = arith.constant 0 : index
    %46 = vector.load %arg4[%c0_17, %c0_18, %c0_19] : memref<6x8x128xf32, #tpu.memory_space<vmem>>, vector<1x8x128xf32>
    %47 = vector.shape_cast %46 : vector<1x8x128xf32> to vector<8x128xf32>
    %48 = vector.shape_cast %41 : vector<8x128xf32> to vector<1x8x128xf32>
    tpu.vector_store %arg4[%c0_17, %c0_18, %c0_19], %48 {strides = array<i32>} : memref<6x8x128xf32, #tpu.memory_space<vmem>>, vector<1x8x128xf32>,
    %c1_20 = arith.constant 1 : index
    %c0_21 = arith.constant 0 : index
    %c0_22 = arith.constant 0 : index
    %49 = vector.load %arg4[%c1_20, %c0_21, %c0_22] : memref<6x8x128xf32, #tpu.memory_space<vmem>>, vector<1x8x128xf32>
    %50 = vector.shape_cast %49 : vector<1x8x128xf32> to vector<8x128xf32>
    %51 = vector.shape_cast %45 : vector<8x128xf32> to vector<1x8x128xf32>
    tpu.vector_store %arg4[%c1_20, %c0_21, %c0_22], %51 {strides = array<i32>} : memref<6x8x128xf32, #tpu.memory_space<vmem>>, vector<1x8x128xf32>,
    %c3 = arith.constant 3 : index
    %c0_23 = arith.constant 0 : index
    %52 = vector.load %arg3[%c3, %c0_23] : memref<9x128xf32, #tpu.memory_space<vmem>>, vector<1x128xf32>
    %c4 = arith.constant 4 : index
    %c0_24 = arith.constant 0 : index
    %53 = vector.load %arg3[%c4, %c0_24] : memref<9x128xf32, #tpu.memory_space<vmem>>, vector<1x128xf32>
    %c5 = arith.constant 5 : index
    %c0_25 = arith.constant 0 : index
    %54 = vector.load %arg3[%c5, %c0_25] : memref<9x128xf32, #tpu.memory_space<vmem>>, vector<1x128xf32>
    %55 = vector.broadcast %0 : vector<8x1xf32> to vector<8x128xf32>
    %56 = vector.broadcast %52 : vector<1x128xf32> to vector<8x128xf32>
    %57 = arith.mulf %55, %56 : vector<8x128xf32>
    %58 = vector.broadcast %1 : vector<8x1xf32> to vector<8x128xf32>
    %59 = vector.broadcast %53 : vector<1x128xf32> to vector<8x128xf32>
    %60 = arith.mulf %58, %59 : vector<8x128xf32>
    %61 = arith.addf %57, %60 : vector<8x128xf32>
    %62 = vector.broadcast %0 : vector<8x1xf32> to vector<8x128xf32>
    %63 = vector.broadcast %53 : vector<1x128xf32> to vector<8x128xf32>
    %64 = arith.mulf %62, %63 : vector<8x128xf32>
    %65 = vector.broadcast %1 : vector<8x1xf32> to vector<8x128xf32>
    %66 = vector.broadcast %52 : vector<1x128xf32> to vector<8x128xf32>
    %67 = arith.mulf %65, %66 : vector<8x128xf32>
    %68 = arith.subf %64, %67 : vector<8x128xf32>
    %cst_26 = arith.constant 3.200000e+01 : f32
    %69 = vector.broadcast %cst_26 : f32 to vector<8x128xf32>
    %70 = arith.subf %68, %69 : vector<8x128xf32>
    %cst_27 = arith.constant 0.000000e+00 : f32
    %71 = vector.broadcast %cst_27 : f32 to vector<1x128xf32>
    %72 = arith.subf %71, %54 : vector<1x128xf32>
    %73 = vector.shape_cast %72 : vector<1x128xf32> to vector<1x128xf32>
    %74 = vector.broadcast %73 : vector<1x128xf32> to vector<8x128xf32>
    %75 = arith.mulf %61, %61 : vector<8x128xf32>
    %76 = arith.mulf %74, %74 : vector<8x128xf32>
    %77 = arith.addf %75, %76 : vector<8x128xf32>
    %78 = arith.mulf %70, %70 : vector<8x128xf32>
    %79 = arith.addf %77, %78 : vector<8x128xf32>
    %80 = math.sqrt %79 : vector<8x128xf32>
    %c1_28 = arith.constant 1 : index
    %c0_29 = arith.constant 0 : index
    %c0_30 = arith.constant 0 : index
    %81 = vector.load %arg5[%c1_28, %c0_29, %c0_30] : memref<3x8x128xf32, #tpu.memory_space<vmem>>, vector<1x8x128xf32>
    %82 = vector.shape_cast %81 : vector<1x8x128xf32> to vector<8x128xf32>
    %83 = vector.shape_cast %80 : vector<8x128xf32> to vector<1x8x128xf32>
    tpu.vector_store %arg5[%c1_28, %c0_29, %c0_30], %83 {strides = array<i32>} : memref<3x8x128xf32, #tpu.memory_space<vmem>>, vector<1x8x128xf32>,
    %cst_31 = arith.constant 1.250000e-01 : f32
    %84 = vector.broadcast %cst_31 : f32 to vector<8x128xf32>
    %85 = arith.mulf %61, %84 : vector<8x128xf32>
    %cst_32 = arith.constant 1.250000e-01 : f32
    %86 = vector.broadcast %cst_32 : f32 to vector<8x128xf32>
    %87 = arith.mulf %74, %86 : vector<8x128xf32>
    %cst_33 = arith.constant 8.000000e+00 : f32
    %88 = vector.broadcast %cst_33 : f32 to vector<8x128xf32>
    %89 = arith.mulf %85, %88 : vector<8x128xf32>
    %cst_34 = arith.constant 8.000000e+00 : f32
    %90 = vector.broadcast %cst_34 : f32 to vector<8x128xf32>
    %91 = arith.addf %89, %90 : vector<8x128xf32>
    %cst_35 = arith.constant 8.000000e+00 : f32
    %92 = vector.broadcast %cst_35 : f32 to vector<8x128xf32>
    %93 = arith.mulf %87, %92 : vector<8x128xf32>
    %cst_36 = arith.constant 7.500000e+00 : f32
    %94 = vector.broadcast %cst_36 : f32 to vector<8x128xf32>
    %95 = arith.subf %94, %93 : vector<8x128xf32>
    %c2_37 = arith.constant 2 : index
    %c0_38 = arith.constant 0 : index
    %c0_39 = arith.constant 0 : index
    %96 = vector.load %arg4[%c2_37, %c0_38, %c0_39] : memref<6x8x128xf32, #tpu.memory_space<vmem>>, vector<1x8x128xf32>
    %97 = vector.shape_cast %96 : vector<1x8x128xf32> to vector<8x128xf32>
    %98 = vector.shape_cast %91 : vector<8x128xf32> to vector<1x8x128xf32>
    tpu.vector_store %arg4[%c2_37, %c0_38, %c0_39], %98 {strides = array<i32>} : memref<6x8x128xf32, #tpu.memory_space<vmem>>, vector<1x8x128xf32>,
    %c3_40 = arith.constant 3 : index
    %c0_41 = arith.constant 0 : index
    %c0_42 = arith.constant 0 : index
    %99 = vector.load %arg4[%c3_40, %c0_41, %c0_42] : memref<6x8x128xf32, #tpu.memory_space<vmem>>, vector<1x8x128xf32>
    %100 = vector.shape_cast %99 : vector<1x8x128xf32> to vector<8x128xf32>
    %101 = vector.shape_cast %95 : vector<8x128xf32> to vector<1x8x128xf32>
    tpu.vector_store %arg4[%c3_40, %c0_41, %c0_42], %101 {strides = array<i32>} : memref<6x8x128xf32, #tpu.memory_space<vmem>>, vector<1x8x128xf32>,
    %c6 = arith.constant 6 : index
    %c0_43 = arith.constant 0 : index
    %102 = vector.load %arg3[%c6, %c0_43] : memref<9x128xf32, #tpu.memory_space<vmem>>, vector<1x128xf32>
    %c7 = arith.constant 7 : index
    %c0_44 = arith.constant 0 : index
    %103 = vector.load %arg3[%c7, %c0_44] : memref<9x128xf32, #tpu.memory_space<vmem>>, vector<1x128xf32>
    %c8 = arith.constant 8 : index
    %c0_45 = arith.constant 0 : index
    %104 = vector.load %arg3[%c8, %c0_45] : memref<9x128xf32, #tpu.memory_space<vmem>>, vector<1x128xf32>
    %105 = vector.broadcast %0 : vector<8x1xf32> to vector<8x128xf32>
    %106 = vector.broadcast %102 : vector<1x128xf32> to vector<8x128xf32>
    %107 = arith.mulf %105, %106 : vector<8x128xf32>
    %108 = vector.broadcast %1 : vector<8x1xf32> to vector<8x128xf32>
    %109 = vector.broadcast %103 : vector<1x128xf32> to vector<8x128xf32>
    %110 = arith.mulf %108, %109 : vector<8x128xf32>
    %111 = arith.addf %107, %110 : vector<8x128xf32>
    %112 = vector.broadcast %0 : vector<8x1xf32> to vector<8x128xf32>
    %113 = vector.broadcast %103 : vector<1x128xf32> to vector<8x128xf32>
    %114 = arith.mulf %112, %113 : vector<8x128xf32>
    %115 = vector.broadcast %1 : vector<8x1xf32> to vector<8x128xf32>
    %116 = vector.broadcast %102 : vector<1x128xf32> to vector<8x128xf32>
    %117 = arith.mulf %115, %116 : vector<8x128xf32>
    %118 = arith.subf %114, %117 : vector<8x128xf32>
    %cst_46 = arith.constant 3.200000e+01 : f32
    %119 = vector.broadcast %cst_46 : f32 to vector<8x128xf32>
    %120 = arith.subf %118, %119 : vector<8x128xf32>
    %cst_47 = arith.constant 0.000000e+00 : f32
    %121 = vector.broadcast %cst_47 : f32 to vector<1x128xf32>
    %122 = arith.subf %121, %104 : vector<1x128xf32>
    %123 = vector.shape_cast %122 : vector<1x128xf32> to vector<1x128xf32>
    %124 = vector.broadcast %123 : vector<1x128xf32> to vector<8x128xf32>
    %125 = arith.mulf %111, %111 : vector<8x128xf32>
    %126 = arith.mulf %124, %124 : vector<8x128xf32>
    %127 = arith.addf %125, %126 : vector<8x128xf32>
    %128 = arith.mulf %120, %120 : vector<8x128xf32>
    %129 = arith.addf %127, %128 : vector<8x128xf32>
    %130 = math.sqrt %129 : vector<8x128xf32>
    %c2_48 = arith.constant 2 : index
    %c0_49 = arith.constant 0 : index
    %c0_50 = arith.constant 0 : index
    %131 = vector.load %arg5[%c2_48, %c0_49, %c0_50] : memref<3x8x128xf32, #tpu.memory_space<vmem>>, vector<1x8x128xf32>
    %132 = vector.shape_cast %131 : vector<1x8x128xf32> to vector<8x128xf32>
    %133 = vector.shape_cast %130 : vector<8x128xf32> to vector<1x8x128xf32>
    tpu.vector_store %arg5[%c2_48, %c0_49, %c0_50], %133 {strides = array<i32>} : memref<3x8x128xf32, #tpu.memory_space<vmem>>, vector<1x8x128xf32>,
    %cst_51 = arith.constant 1.250000e-01 : f32
    %134 = vector.broadcast %cst_51 : f32 to vector<8x128xf32>
    %135 = arith.mulf %111, %134 : vector<8x128xf32>
    %cst_52 = arith.constant 1.250000e-01 : f32
    %136 = vector.broadcast %cst_52 : f32 to vector<8x128xf32>
    %137 = arith.mulf %124, %136 : vector<8x128xf32>
    %cst_53 = arith.constant 8.000000e+00 : f32
    %138 = vector.broadcast %cst_53 : f32 to vector<8x128xf32>
    %139 = arith.mulf %135, %138 : vector<8x128xf32>
    %cst_54 = arith.constant 8.000000e+00 : f32
    %140 = vector.broadcast %cst_54 : f32 to vector<8x128xf32>
    %141 = arith.addf %139, %140 : vector<8x128xf32>
    %cst_55 = arith.constant 8.000000e+00 : f32
    %142 = vector.broadcast %cst_55 : f32 to vector<8x128xf32>
    %143 = arith.mulf %137, %142 : vector<8x128xf32>
    %cst_56 = arith.constant 7.500000e+00 : f32
    %144 = vector.broadcast %cst_56 : f32 to vector<8x128xf32>
    %145 = arith.subf %144, %143 : vector<8x128xf32>
    %c4_57 = arith.constant 4 : index
    %c0_58 = arith.constant 0 : index
    %c0_59 = arith.constant 0 : index
    %146 = vector.load %arg4[%c4_57, %c0_58, %c0_59] : memref<6x8x128xf32, #tpu.memory_space<vmem>>, vector<1x8x128xf32>
    %147 = vector.shape_cast %146 : vector<1x8x128xf32> to vector<8x128xf32>
    %148 = vector.shape_cast %141 : vector<8x128xf32> to vector<1x8x128xf32>
    tpu.vector_store %arg4[%c4_57, %c0_58, %c0_59], %148 {strides = array<i32>} : memref<6x8x128xf32, #tpu.memory_space<vmem>>, vector<1x8x128xf32>,
    %c5_60 = arith.constant 5 : index
    %c0_61 = arith.constant 0 : index
    %c0_62 = arith.constant 0 : index
    %149 = vector.load %arg4[%c5_60, %c0_61, %c0_62] : memref<6x8x128xf32, #tpu.memory_space<vmem>>, vector<1x8x128xf32>
    %150 = vector.shape_cast %149 : vector<1x8x128xf32> to vector<8x128xf32>
    %151 = vector.shape_cast %145 : vector<8x128xf32> to vector<1x8x128xf32>
    tpu.vector_store %arg4[%c5_60, %c0_61, %c0_62], %151 {strides = array<i32>} : memref<6x8x128xf32, #tpu.memory_space<vmem>>, vector<1x8x128xf32>,
    %152 = arith.subf %61, %11 : vector<8x128xf32>
    %153 = arith.subf %74, %24 : vector<8x128xf32>
    %154 = arith.subf %111, %11 : vector<8x128xf32>
    %155 = arith.subf %124, %24 : vector<8x128xf32>
    %156 = arith.mulf %153, %154 : vector<8x128xf32>
    %157 = arith.mulf %152, %155 : vector<8x128xf32>
    %158 = arith.subf %156, %157 : vector<8x128xf32>
    %c0_63 = arith.constant 0 : index
    %c0_64 = arith.constant 0 : index
    %159 = vector.load %arg6[%c0_63, %c0_64] : memref<8x128xf32, #tpu.memory_space<vmem>>, vector<8x128xf32>
    tpu.vector_store %arg6[%c0_63, %c0_64], %158 {strides = array<i32>} : memref<8x128xf32, #tpu.memory_space<vmem>>, vector<8x128xf32>,
    return
  }
  func.func @transform_0(%arg0: i32, %arg1: i32) -> (i32, i32) {
    %c0_i32 = arith.constant 0 : i32
    %c0_i32_0 = arith.constant 0 : i32
    return %arg0, %c0_i32 : i32, i32
  }
  func.func @transform_1(%arg0: i32, %arg1: i32) -> (i32, i32) {
    %c0_i32 = arith.constant 0 : i32
    %c0_i32_0 = arith.constant 0 : i32
    return %c0_i32, %arg1 : i32, i32
  }
  func.func @transform_2(%arg0: i32, %arg1: i32) -> (i32, i32, i32) {
    %c0_i32 = arith.constant 0 : i32
    %c0_i32_0 = arith.constant 0 : i32
    return %c0_i32, %arg0, %arg1 : i32, i32, i32
  }
  func.func @transform_3(%arg0: i32, %arg1: i32) -> (i32, i32, i32) {
    %c0_i32 = arith.constant 0 : i32
    %c0_i32_0 = arith.constant 0 : i32
    return %c0_i32, %arg0, %arg1 : i32, i32, i32
  }
  func.func @transform_4(%arg0: i32, %arg1: i32) -> (i32, i32) {
    %c0_i32 = arith.constant 0 : i32
    return %arg0, %arg1 : i32, i32
  }
}

</mosaic_0001>

<bundles_post_ra>
// kernel: tpu_custom_call.1
= control target key start
LH: loop header
LB: loop body
LE: loop exit
PB: predicated region body
PF: predicated region fallthrough
CT: control target
= control target key end

     0   :  { %10 = vsyncpa [#allocation3], 0  ;;  %s426_s0 = inlined_call_operand.vmem [shape: f32[8,2], index: 0, kind: input, shape index: {}]   ;;  %s427_s1 = inlined_call_operand.hbm [shape: f32[9,128], index: 1, kind: input, shape index: {}]   ;;  %s428_s2 = inlined_call_operand.hbm [shape: f32[6,8,128], index: 2, kind: output, shape index: {0}]   ;;  %s429_s3 = inlined_call_operand.hbm [shape: f32[3,8,128], index: 3, kind: output, shape index: {1}]   ;;  %s430_s4 = inlined_call_operand.hbm [shape: f32[8,128], index: 4, kind: output, shape index: {2}]  }
   0x1   :  { %11 = vsyncpa [#allocation4], 0 }
   0x2   :  { %12 = vsyncpa [#allocation7], 0  ;;  %s344_s15 = smov [#allocation2]  }
   0x3   :  { %s20_s16 = sshll.u32 %s344_s15, 4  ;;  %s21_s16 = int_to_ptr.vmem [resolvable:$true] %s20_s16 }
   0x4   :  { %s266_s17 = scalar_lea.vmem %s21_s16, 256  ;;  %p271_p1 = scmp.lt.s32.totalorder %s21_s16, %s21_s16 }
   0x5   :  { %p267_p0 = scmp.ne.s32.totalorder %s21_s16, %s266_s17  ;;  %p272_p2 = scmp.lt.s32.totalorder %s266_s17, %s266_s17 }
   0x7   :  { %p273_p3 = por %p272_p2, %p271_p1 }
   0x9   :  { %p274_p4 = pnand %p273_p3, %p267_p0 }
   0xb   :  { %277 = shalt.err (!%p274_p4)
}
   0xc   :  { %s345_s18 = smov 128   ;;  %s346_s19 = smov 8  }
   0xd   :  { %26 = dma.hbm_to_vmem [thread:$0]  %s427_s1, 256, %s21_s16, [#allocation3], %s345_s18, %s345_s18, %s346_s19  }
   0xe   :  { %338 = dma.done.wait [#allocation3], 256  }
   0xf   :  { %339 = vsyncadd [#allocation3], 4294967040  ;;  %v347_v0 = vmov 0   ;;  %v59_v1 = vlaneseq  ;;  %v30_v2 = vld [vmem:[%s426_s0] sm:$0xff]  ;;  %v134_v6 = vld [vmem:[#allocation2 + $0x8] sm:$0x1] }
  0x10   :  { %250 = vset.pattern.permute.xlu0 %v347_v0  ;;  %v33_v4 = vld [vmem:[#allocation2 + $0x2] sm:$0x1]  ;;  %v87_v5 = vld [vmem:[#allocation2 + $0x5] sm:$0x1]  ;;  %v348_v7 = vmov 1   ;;  %v150_v11 = vsub.f32 0.0, %v134_v6 }
  0x11   :  { %36 = vperm.xlu0 %250, %v30_v2   ;;  %v60_v3 = vshrl.u32 %v59_v1, 7  ;;  %v58_v8 = vsub.f32 0.0, %v33_v4  ;;  %v103_v10 = vsub.f32 0.0, %v87_v5  ;;  %v233_v27 = vld [vmem:[#allocation2] ss:$0 sm:$0xff]  ;;  %s349_s0 = smov [#allocation5]  }
  0x12   :  { %v234_v28 = vld [vmem:[#allocation2 + $0x1] ss:$0 sm:$0xff]  ;;  %v236_v29 = vld [vmem:[#allocation2 + $0x3] ss:$0 sm:$0xff]  ;;  %v237_v30 = vld [vmem:[#allocation2 + $0x4] ss:$0 sm:$0xff] }
  0x13   :  { %v61_v9 = vsub.s32 0, %v60_v3  ;;  %v239_v33 = vld [vmem:[#allocation2 + $0x6] ss:$0 sm:$0xff]  ;;  %v240_v34 = vld [vmem:[#allocation2 + $0x7] ss:$0 sm:$0xff]  ;;  %s192_s1 = sshll.u32 %s349_s0, 4  ;;  %s193_s1 = int_to_ptr.vmem [resolvable:$true] %s192_s1 }
  0x14   :  { %s278_s24 = scalar_lea.vmem %s193_s1, 768  ;;  %p283_p6 = scmp.lt.s32.totalorder %s193_s1, %s193_s1 }
  0x15   :  { %251 = vset.pattern.permute.xlu0 %v348_v7  ;;  %v386_v12 = vrot.slane %v58_v8, %v61_v9  ;;  %v388_v13 = vrot.slane %v103_v10, %v61_v9  ;;  %v390_v14 = vrot.slane %v150_v11, %v61_v9  ;;  %p279_p5 = scmp.ne.s32.totalorder %s193_s1, %s278_s24  ;;  %p284_p7 = scmp.lt.s32.totalorder %s278_s24, %s278_s24 }
  0x16   :  { %45 = vperm.xlu0 %251, %v30_v2  }
  0x17   :  { %v180_v15 = vsub.f32 %v388_v13, %v386_v12  ;;  %v182_v16 = vsub.f32 %v390_v14, %v386_v12  ;;  %v77_v17 = vmul.f32 0.125, %v386_v12  ;;  %v123_v18 = vmul.f32 0.125, %v388_v13  ;;  %p285_p8 = por %p284_p7, %p283_p6 }
  0x18   :  { %v170_v19 = vmul.f32 0.125, %v390_v14  ;;  %v64_v31 = vmul.f32 %v386_v12, %v386_v12  ;;  %v109_v32 = vmul.f32 %v388_v13, %v388_v13  ;;  %v156_v52 = vmul.f32 %v390_v14, %v390_v14 }
  0x19   :  { %v80_v20 = vmul.f32 8.0, %v77_v17  ;;  %v126_v21 = vmul.f32 8.0, %v123_v18  ;;  %p286_p9 = pnand %p285_p8, %p279_p5 }
  0x1a   :  { %v173_v22 = vmul.f32 8.0, %v170_v19 }
  0x1b   :  { %v81_v23 = vsub.f32 7.5, %v80_v20  ;;  %v127_v24 = vsub.f32 7.5, %v126_v21 }
  0x1c   :  { %v174_v25 = vsub.f32 7.5, %v173_v22 }
  0x1d   :  { %84 = vst [vmem:[#allocation5 + $0x8] sm:$0xff] %v81_v23  ;;  %131 = vst [vmem:[#allocation5 + $0x18] sm:$0xff] %v127_v24 }
  0x1e   :  { %178 = vst [vmem:[#allocation5 + $0x28] sm:$0xff] %v174_v25 }
  0x8c   :  { %v37_v26 = vpop.permute.xlu0 %36 }
  0x8d   :  { %v43_v35 = vmul.f32 %v233_v27, %v37_v26  ;;  %v54_v36 = vmul.f32 %v234_v28, %v37_v26  ;;  %v92_v37 = vmul.f32 %v236_v29, %v37_v26  ;;  %v99_v38 = vmul.f32 %v237_v30, %v37_v26 }
  0x8e   :  { %v139_v44 = vmul.f32 %v239_v33, %v37_v26  ;;  %v146_v45 = vmul.f32 %v240_v34, %v37_v26 }
  0x91   :  { %v46_v39 = vpop.permute.xlu0 %45 }
  0x92   :  { %v52_v40 = vmul.f32 %v234_v28, %v46_v39  ;;  %v55_v41 = vmul.f32 %v233_v27, %v46_v39  ;;  %v97_v42 = vmul.f32 %v237_v30, %v46_v39  ;;  %v100_v43 = vmul.f32 %v236_v29, %v46_v39 }
  0x93   :  { %v144_v46 = vmul.f32 %v240_v34, %v46_v39  ;;  %v147_v47 = vmul.f32 %v239_v33, %v46_v39 }
  0x94   :  { %v53_v48 = vadd.f32 %v52_v40, %v43_v35  ;;  %v56_v49 = vsub.f32 %v54_v36, %v55_v41  ;;  %v98_v50 = vadd.f32 %v97_v42, %v92_v37  ;;  %v101_v51 = vsub.f32 %v99_v38, %v100_v43 }
  0x95   :  { %v145_v53 = vadd.f32 %v144_v46, %v139_v44  ;;  %v148_v54 = vsub.f32 %v146_v45, %v147_v47 }
  0x96   :  { %v235_v55 = vadd.f32 -32.0, %v56_v49  ;;  %v63_v56 = vmul.f32 %v53_v48, %v53_v48  ;;  %v238_v57 = vadd.f32 -32.0, %v101_v51  ;;  %v108_v58 = vmul.f32 %v98_v50, %v98_v50 }
  0x97   :  { %v122_v59 = vmul.f32 0.125, %v98_v50  ;;  %v241_v60 = vadd.f32 -32.0, %v148_v54  ;;  %v155_v61 = vmul.f32 %v145_v53, %v145_v53  ;;  %v169_v62 = vmul.f32 0.125, %v145_v53 }
  0x98   :  { %v65_v63 = vadd.f32 %v64_v31, %v63_v56  ;;  %v66_v0 = vmul.f32 %v235_v55, %v235_v55  ;;  %v110_v1 = vadd.f32 %v109_v32, %v108_v58  ;;  %v111_v2 = vmul.f32 %v238_v57, %v238_v57 }
  0x99   :  { %v124_v3 = vmul.f32 8.0, %v122_v59  ;;  %v157_v4 = vadd.f32 %v156_v52, %v155_v61  ;;  %v158_v5 = vmul.f32 %v241_v60, %v241_v60  ;;  %v171_v6 = vmul.f32 8.0, %v169_v62 }
  0x9a   :  { %v67_v7 = vadd.f32 %v66_v0, %v65_v63  ;;  %v112_v8 = vadd.f32 %v111_v2, %v110_v1  ;;  %v76_v9 = vmul.f32 0.125, %v53_v48  ;;  %v179_v10 = vsub.f32 %v98_v50, %v53_v48 }
  0x9b   :  { %v125_v11 = vadd.f32 8.0, %v124_v3  ;;  %v159_v17 = vadd.f32 %v158_v5, %v157_v4  ;;  %v172_v18 = vadd.f32 8.0, %v171_v6  ;;  %v181_v19 = vsub.f32 %v145_v53, %v53_v48 }
  0x9c   :  { %252 = vrsqrt.f32 %v67_v7  ;;  %v78_v20 = vmul.f32 8.0, %v76_v9  ;;  %v184_v22 = vmul.f32 %v182_v16, %v179_v10 }
  0x9d   :  { %129 = vst [vmem:[#allocation5 + $0x10] sm:$0xff] %v125_v11  ;;  %176 = vst [vmem:[#allocation5 + $0x20] sm:$0xff] %v172_v18  ;;  %254 = vrsqrt.f32 %v112_v8  ;;  %v183_v21 = vmul.f32 %v181_v19, %v180_v15 }
  0x9e   :  { %256 = vrsqrt.f32 %v159_v17  ;;  %v79_v23 = vadd.f32 8.0, %v78_v20 }
  0x9f   :  { %v185_v24 = vsub.f32 %v183_v21, %v184_v22 }
  0xa0   :  { %82 = vst [vmem:[#allocation5] sm:$0xff] %v79_v23 }
  0xa1   :  { %186 = vst [vmem:[#allocation8] sm:$0xff] %v185_v24 }
  0xa2   :  { %289 = shalt.err (!%p286_p9)
}
  0xa3   :  { %198 = dma.vmem_to_hbm [thread:$0]  %s193_s1, 768, %s428_s2, [#allocation4], %s345_s18, %s345_s18, %s346_s19   ;;  %vm70_vm0 = vcmp.eq.f32.partialorder %v67_v7, inf  ;;  %vm72_vm1 = vcmp.eq.f32.partialorder %v67_v7, 0.0  ;;  %v73_v16 = vand.u32 2147483648, %v67_v7  ;;  %vm115_vm2 = vcmp.eq.f32.partialorder %v112_v8, inf }
  0xa4   :  { %s350_s27 = smov [#allocation6]   ;;  %vm117_vm3 = vcmp.eq.f32.partialorder %v112_v8, 0.0  ;;  %v118_v27 = vand.u32 2147483648, %v112_v8  ;;  %s351_s29 = smov [#allocation8]   ;;  %vm162_vm4 = vcmp.eq.f32.partialorder %v159_v17, inf  ;;  %v165_v31 = vand.u32 2147483648, %v159_v17 }
  0xa5   :  { %s204_s28 = sshll.u32 %s350_s27, 4  ;;  %s217_s30 = sshll.u32 %s351_s29, 4  ;;  %vm164_vm5 = vcmp.eq.f32.partialorder %v159_v17, 0.0  ;;  %s205_s28 = int_to_ptr.vmem [resolvable:$true] %s204_s28  ;;  %s218_s30 = int_to_ptr.vmem [resolvable:$true] %s217_s30 }
  0xa6   :  { %s298_s2 = scalar_lea.vmem %s205_s28, 384  ;;  %p303_p11 = scmp.lt.s32.totalorder %s205_s28, %s205_s28 }
  0xa7   :  { %p299_p10 = scmp.ne.s32.totalorder %s205_s28, %s298_s2  ;;  %p304_p12 = scmp.lt.s32.totalorder %s298_s2, %s298_s2 }
  0xa9   :  { %v253_v12 = vpop.eup %252  ;;  %p305_p13 = por %p304_p12, %p303_p11 }
  0xaa   :  { %v255_v13 = vpop.eup %254  ;;  %v69_v14 = vmul.f32 %v253_v12, %v67_v7 }
  0xab   :  { %v257_v15 = vpop.eup %256  ;;  %v114_v25 = vmul.f32 %v255_v13, %v112_v8  ;;  %p306_p0 = pnand %p305_p13, %p299_p10 }
  0xac   :  { %v71_v26 = vsel %vm70_vm0, %v67_v7, %v69_v14  ;;  %v161_v28 = vmul.f32 %v257_v15, %v159_v17 }
  0xad   :  { %v74_v29 = vsel %vm72_vm1, %v73_v16, %v71_v26  ;;  %v116_v30 = vsel %vm115_vm2, %v112_v8, %v114_v25 }
  0xae   :  { %75 = vst [vmem:[#allocation6] sm:$0xff] %v74_v29  ;;  %v119_v32 = vsel %vm117_vm3, %v118_v27, %v116_v30  ;;  %v163_v33 = vsel %vm162_vm4, %v159_v17, %v161_v28 }
  0xaf   :  { %121 = vst [vmem:[#allocation6 + $0x8] sm:$0xff] %v119_v32  ;;  %v166_v34 = vsel %vm164_vm5, %v165_v31, %v163_v33 }
  0xb0   :  { %168 = vst [vmem:[#allocation6 + $0x10] sm:$0xff] %v166_v34 }
  0xb1   :  { %309 = shalt.err (!%p306_p0)
}
  0xb2   :  { %210 = dma.vmem_to_hbm [thread:$0]  %s205_s28, 384, %s429_s3, [#allocation7], %s345_s18, %s345_s18, %s346_s19  }
  0xb3   :  { %s318_s7 = scalar_lea.vmem %s218_s30, 128  ;;  %p323_p2 = scmp.lt.s32.totalorder %s218_s30, %s218_s30 }
  0xb4   :  { %p319_p1 = scmp.ne.s32.totalorder %s218_s30, %s318_s7  ;;  %p324_p3 = scmp.lt.s32.totalorder %s318_s7, %s318_s7 }
  0xb6   :  { %p325_p4 = por %p324_p3, %p323_p2 }
  0xb8   :  { %p326_p5 = pnand %p325_p4, %p319_p1 }
  0xba   :  { %329 = shalt.err (!%p326_p5)
}
  0xbb   :  { %220 = dma.vmem_to_hbm [thread:$0]  %s218_s30, 128, %s430_s4, [#allocation7]  }
  0xbc   :  { %340 = dma.done.wait [#allocation4], 768  }
  0xbd   :  { %341 = vsyncadd [#allocation4], 4294966528 }
  0xbe   :  { %342 = dma.done.wait [#allocation7], 512  }
  0xbf   :  { %343 = vsyncadd [#allocation7], 4294966784 }
  0xc0   :  { %230 = vsyncpa [#allocation3], 1 }
  0xc1   :  { %231 = vsyncpa [#allocation4], 1 }
  0xc2   :  { %232 = vsyncpa [#allocation7], 1 }

</bundles_post_ra>
